<compile_context>
chip_gen: v5e
topology: v5e:2x2
jax: 0.10.0
libtpu: 0.0.40
codegen_flags: <defaults>
</compile_context>

<pallas_src>
import functools

import jax
import jax.numpy as jnp
from jax import lax
from jax.experimental import pallas as pl
from jax.experimental.pallas import tpu as pltpu


_LANE = 128
_PER_BUFFER_TARGET = 4 * 1024 * 1024  # lane-padded bytes per logits buffer


def _round_up(v, m):
    return -(-v // m) * m


def _vmem_budget_bytes():
    """Total budget for the double-buffered pipeline (lane-padded bytes).

    Conservative default is safe on v7x (64 MiB physical per TensorCore);
    raised toward ~96 MiB on v5e/v6e (128 MiB) when the chip can be queried.
    """
    budget = 40 * 1024 * 1024
    try:
        cap = int(pltpu.get_tpu_info().vmem_capacity_bytes)
        budget = max(budget, min((cap * 3) // 4, 96 * 1024 * 1024))
    except Exception:
        pass
    return budget


def _pick_tile_rows(n, c, x_dtype, total_budget_bytes):
    """Pick the row tile TN from lane-padded VMEM accounting.

    Per grid step Pallas double-buffers every operand. Lane-padded VMEM bytes
    per logit row:
      logits block (TN, C)      : roundup(C,128) * itemsize
      targets block (1, 1, TN)  : 8 sublanes * 4 B -> 32 B / row
      output  block (1, 1, TN)  : 8 sublanes * 4 B -> 32 B / row
    """
    itemsize = jnp.dtype(x_dtype).itemsize
    c_pad = _round_up(c, _LANE)
    per_row = 2 * c_pad * itemsize + 2 * 32 + 2 * 32
    tn = min(total_budget_bytes // per_row,
             _PER_BUFFER_TARGET // (c_pad * itemsize))
    # Multiple of 128 -> lane-dense target/output blocks; also covers the
    # 8/16/32 sublane packing of f32/bf16/int8 logits tiles.
    tn = max(_LANE, (tn // _LANE) * _LANE)

    n_rows = _round_up(n, _LANE)
    tn = min(tn, n_rows)

    # v7x has 2 TensorCores: keep >=4 grid steps (when there is enough work)
    # so the "parallel" row axis can shard across both cores.  On 1-TC chips
    # (v5e/v6e) the few extra grid steps cost ~1 us total -- negligible.
    if n_rows >= 4 * _LANE:
        tn = min(tn, _round_up(pl.cdiv(n_rows, 4), _LANE))
    return tn


def _label_smoothing_kernel(x_ref, tgt_ref, loss_ref, *, confidence, smoothing,
                            num_classes):
    # x_ref   : (TN, C)     logits tile (HBM dtype) in VMEM
    # tgt_ref : (1, 1, TN)  int32 class indices, lane-dense
    # loss_ref: (1, 1, TN)  f32 per-row smoothed loss, lane-dense
    #
    # Compute in the transposed (C, TN) domain: every per-row reduction and the
    # final store are lane-dense.  The single transpose rides the idle XLU slot
    # (the kernel is HBM/DMA + step-overhead bound).
    xt = jnp.transpose(x_ref[...].astype(jnp.float32))          # (C, TN)

    # Numerically-stable logsumexp pieces (per original row == per column).
    m = jnp.max(xt, axis=0, keepdims=True)                      # (1, TN)
    shifted = xt - m                                            # (C, TN)
    lse = jnp.log(jnp.sum(jnp.exp(shifted), axis=0, keepdims=True))  # (1, TN)

    # Fused smoothing weights (sum_j w_j == 1):
    #   loss = confidence*nll + smoothing*smooth = lse - sum_j w_j*(x_j - m)
    tgt = tgt_ref[0]                                            # (1, TN) int32
    cls = lax.broadcasted_iota(jnp.int32, xt.shape, 0)          # (C, TN)
    w_hit = jnp.float32(confidence + smoothing / num_classes)
    w_miss = jnp.float32(smoothing / num_classes)
    w = jnp.where(cls == tgt, w_hit, w_miss)                    # (C, TN)

    loss_ref[0] = lse - jnp.sum(w * shifted, axis=0, keepdims=True)


def label_smoothing_loss(x, target, smoothing=0.1, *, tile_rows=None):
    """Label-smoothed NLL loss, matching PyTorch LabelSmoothing.forward.

    x:      (N, C) logits (f32 or bf16 -- kept in HBM dtype, upcast in-kernel).
    target: (N,)   integer class indices.
    tile_rows: optional row-tile override (multiple of 8; 128-multiples best).
    """
    confidence = 1.0 - smoothing
    n, c = x.shape
    itemsize = jnp.dtype(x.dtype).itemsize

    budget = _vmem_budget_bytes()
    tn = tile_rows if tile_rows is not None else _pick_tile_rows(
        n, c, x.dtype, budget)
    num_tiles = pl.cdiv(n, tn)
    n_pad = num_tiles * tn

    # Lane-dense targets: one contiguous (1, 1, TN) int32 block per grid step
    # (the old (TN,1) layout cost TN*512 B of VMEM per buffer + strided DMA).
    tgt = target.astype(jnp.int32)
    if n_pad != n:
        tgt = jnp.pad(tgt, (0, n_pad - n))
    tgt = tgt.reshape(num_tiles, 1, tn)

    kernel = functools.partial(
        _label_smoothing_kernel,
        confidence=confidence,
        smoothing=smoothing,
        num_classes=c,
    )

    cost = pl.CostEstimate(
        flops=7 * n * c,
        transcendentals=n * c + n,
        bytes_accessed=n * c * itemsize + n * 4 + n * 4,
    )

    per_row = pl.pallas_call(
        kernel,
        out_shape=jax.ShapeDtypeStruct((num_tiles, 1, tn), jnp.float32),
        grid=(num_tiles,),
        in_specs=[
            pl.BlockSpec((tn, c), lambda i: (i, 0)),
            pl.BlockSpec((1, 1, tn), lambda i: (i, 0, 0)),
        ],
        # Lane-dense output: unmasked vst, no sublane-strided writeback.
        out_specs=pl.BlockSpec((1, 1, tn), lambda i: (i, 0, 0)),
        compiler_params=pltpu.CompilerParams(
            dimension_semantics=("parallel",),   # no accumulator across tiles
            vmem_limit_bytes=budget + 8 * 1024 * 1024,
        ),
        cost_estimate=cost,
    )(x, tgt)

    # Rows beyond N in the last (ragged) logits tile contain unspecified data;
    # their loss lanes are sliced off here, so the mean over true N is exact.
    return jnp.mean(per_row.reshape(-1)[:n])


def _reference(x, target, smoothing=0.1):
    confidence = 1.0 - smoothing
    logprobs = jax.nn.log_softmax(x.astype(jnp.float32), axis=-1)
    nll = -jnp.take_along_axis(logprobs, target[:, None], axis=-1)[:, 0]
    smooth = -jnp.mean(logprobs, axis=-1)
    return jnp.mean(confidence * nll + smoothing * smooth)


if __name__ == "__main__":
    key = jax.random.PRNGKey(0)
    kx, kt = jax.random.split(key)
    smoothing = 0.1
    C = 10

    # CIFAR-10 style logits; non-multiple-of-128 batch exercises the ragged tile.
    N = 37
    x = jax.random.normal(kx, (N, C), dtype=jnp.float32)
    target = jax.random.randint(kt, (N,), 0, C, dtype=jnp.int32)
    ref = _reference(x, target, smoothing)
    loss = jax.block_until_ready(label_smoothing_loss(x, target, smoothing))
    assert jnp.allclose(loss, ref, atol=1e-5, rtol=1e-5), (loss, ref)

    # Multiple tiles + ragged last tile + target padding.
    N2 = 300
    x2 = jax.random.normal(kx, (N2, C), dtype=jnp.float32)
    t2 = jax.random.randint(kt, (N2,), 0, C, dtype=jnp.int32)
    ref2 = _reference(x2, t2, smoothing)
    loss2 = jax.block_until_ready(
        label_smoothing_loss(x2, t2, smoothing, tile_rows=128))
    assert jnp.allclose(loss2, ref2, atol=1e-5, rtol=1e-5), (loss2, ref2)

    # bf16 logits stay bf16 in HBM (half the DMA bytes); upcast in-kernel.
    x_bf16 = x2.astype(jnp.bfloat16)
    ref_bf16 = _reference(x_bf16.astype(jnp.float32), t2, smoothing)
    loss_bf16 = jax.block_until_ready(
        label_smoothing_loss(x_bf16, t2, smoothing))
    assert jnp.allclose(loss_bf16, ref_bf16, atol=1e-4, rtol=1e-4), (
        loss_bf16, ref_bf16)

    print("KERNEL_OK")
</pallas_src>

<mosaic_0001>
module attributes {stable_mosaic.version = 11 : i64} {
  func.func @_label_smoothing_kernel(%arg0: i32, %arg1: memref<128x10xf32, #tpu.memory_space<vmem>>, %arg2: memref<1x1x128xi32, #tpu.memory_space<vmem>>, %arg3: memref<1x1x128xf32, #tpu.memory_space<vmem>>) attributes {dimension_semantics = [#tpu.dimension_semantics<parallel>], iteration_bounds = array<i64: 1>, scalar_prefetch = 0 : i64, scratch_operands = 0 : i64, tpu.core_type = #tpu.core_type<tc>, window_params = [{transform_indices = @transform_0, window_bounds = array<i64: 128, 10>}, {transform_indices = @transform_1, window_bounds = array<i64: 1, 1, 128>}, {transform_indices = @transform_2, window_bounds = array<i64: 1, 1, 128>}]} {
    %c0 = arith.constant 0 : index
    %c0_0 = arith.constant 0 : index
    %0 = vector.load %arg1[%c0, %c0_0] : memref<128x10xf32, #tpu.memory_space<vmem>>, vector<128x10xf32>
    %1 = tpu.transpose %0, [1, 0] : vector<128x10xf32> -> vector<10x128xf32>
    %cst = arith.constant dense<0xFF800000> : vector<128xf32>
    %2 = vector.multi_reduction <maximumf>, %1, %cst [0] : vector<10x128xf32> to vector<128xf32>
    %3 = vector.shape_cast %2 : vector<128xf32> to vector<1x128xf32>
    %4 = vector.broadcast %3 : vector<1x128xf32> to vector<10x128xf32>
    %5 = arith.subf %1, %4 : vector<10x128xf32>
    %6 = math.exp %5 : vector<10x128xf32>
    %cst_1 = arith.constant dense<0.000000e+00> : vector<128xf32>
    %7 = vector.multi_reduction <add>, %6, %cst_1 [0] : vector<10x128xf32> to vector<128xf32>
    %8 = vector.shape_cast %7 : vector<128xf32> to vector<1x128xf32>
    %9 = math.log %8 : vector<1x128xf32>
    %c0_2 = arith.constant 0 : index
    %c0_3 = arith.constant 0 : index
    %c0_4 = arith.constant 0 : index
    %10 = vector.load %arg2[%c0_2, %c0_3, %c0_4] : memref<1x1x128xi32, #tpu.memory_space<vmem>>, vector<1x1x128xi32>
    %11 = vector.shape_cast %10 : vector<1x1x128xi32> to vector<1x128xi32>
    %12 = tpu.iota {dimensions = array<i32: 0>} : vector<10x128xi32>
    %13 = vector.broadcast %11 : vector<1x128xi32> to vector<10x128xi32>
    %14 = arith.cmpi eq, %12, %13 : vector<10x128xi32>
    %cst_5 = arith.constant 9.100000e-01 : f32
    %cst_6 = arith.constant 0.00999999977 : f32
    %15 = vector.broadcast %cst_5 : f32 to vector<10x128xf32>
    %16 = vector.broadcast %cst_6 : f32 to vector<10x128xf32>
    %17 = arith.select %14, %15, %16 : vector<10x128xi1>, vector<10x128xf32>
    %18 = arith.mulf %17, %5 : vector<10x128xf32>
    %cst_7 = arith.constant dense<0.000000e+00> : vector<128xf32>
    %19 = vector.multi_reduction <add>, %18, %cst_7 [0] : vector<10x128xf32> to vector<128xf32>
    %20 = vector.shape_cast %19 : vector<128xf32> to vector<1x128xf32>
    %21 = arith.subf %9, %20 : vector<1x128xf32>
    %c0_8 = arith.constant 0 : index
    %c0_9 = arith.constant 0 : index
    %c0_10 = arith.constant 0 : index
    %22 = vector.load %arg3[%c0_8, %c0_9, %c0_10] : memref<1x1x128xf32, #tpu.memory_space<vmem>>, vector<1x1x128xf32>
    %23 = vector.shape_cast %22 : vector<1x1x128xf32> to vector<1x128xf32>
    %24 = vector.shape_cast %21 : vector<1x128xf32> to vector<1x1x128xf32>
    tpu.vector_store %arg3[%c0_8, %c0_9, %c0_10], %24 {strides = array<i32>} : memref<1x1x128xf32, #tpu.memory_space<vmem>>, vector<1x1x128xf32>,
    return
  }
  func.func @transform_0(%arg0: i32) -> (i32, i32) {
    %c0_i32 = arith.constant 0 : i32
    %c0_i32_0 = arith.constant 0 : i32
    return %arg0, %c0_i32 : i32, i32
  }
  func.func @transform_1(%arg0: i32) -> (i32, i32, i32) {
    %c0_i32 = arith.constant 0 : i32
    %c0_i32_0 = arith.constant 0 : i32
    %c0_i32_1 = arith.constant 0 : i32
    return %arg0, %c0_i32, %c0_i32_0 : i32, i32, i32
  }
  func.func @transform_2(%arg0: i32) -> (i32, i32, i32) {
    %c0_i32 = arith.constant 0 : i32
    %c0_i32_0 = arith.constant 0 : i32
    %c0_i32_1 = arith.constant 0 : i32
    return %arg0, %c0_i32, %c0_i32_0 : i32, i32, i32
  }
}

</mosaic_0001>

<bundles_post_ra>
// kernel: tpu_custom_call.1
= control target key start
LH: loop header
LB: loop body
LE: loop exit
PB: predicated region body
PF: predicated region fallthrough
CT: control target
= control target key end

     0   :  { %s231_s0 = inlined_call_operand.vmem [shape: f32[37,10], index: 0, kind: input, shape index: {}]   ;;  %s232_s1 = inlined_call_operand.vmem [shape: s32[1,1,128], index: 1, kind: input, shape index: {}]   ;;  %s233_s2 = inlined_call_operand.hbm [shape: f32[1,1,128], index: 2, kind: output, shape index: {}]  }
   0x1   :  { %v12_v0 = vld [vmem:[%s231_s0] sm:$0xff] }
   0x2   :  { %28 = vxpose.xlu0.b32.start [1/16] (narrow) %v12_v0, 16 }
   0x3   :  { %7 = vsyncpa [#allocation3], 0  ;;  %v13_v1 = vld [vmem:[%s231_s0 + $0x8] sm:$0xff]  ;;  %v14_v2 = vld [vmem:[%s231_s0 + $0x10] sm:$0xff]  ;;  %vm60_vm0 = vcmask 1041408   ;;  %v86_v19 = vlaneseq  ;;  %s113_s17 = sshll.u32 %s233_s2, 4  ;;  %s114_s17 = int_to_ptr.hbm [resolvable:$true] %s113_s17 }
   0x4   :  { %v15_v3 = vld [vmem:[%s231_s0 + $0x18] sm:$0xff]  ;;  %v16_v4 = vld [vmem:[%s231_s0 + $0x20] sm:$0xff]  ;;  %v17_v5 = vld [vmem:[%s231_s0 + $0x28] sm:$0xff]  ;;  %v157_v32 = vmov 0.01  }
   0x5   :  { %v18_v6 = vld [vmem:[%s231_s0 + $0x30] sm:$0xff]  ;;  %v19_v7 = vld [vmem:[%s231_s0 + $0x38] sm:$0xff]  ;;  %v20_v8 = vld [vmem:[%s231_s0 + $0x40] sm:$0xff]  ;;  %v87_v22 = vshrl.u32 %v86_v19, 7 }
   0x6   :  { %v21_v9 = vld [vmem:[%s231_s0 + $0x48] sm:$0xff]  ;;  %v22_v10 = vld [vmem:[%s231_s0 + $0x50] sm:$0xff]  ;;  %v23_v11 = vld [vmem:[%s231_s0 + $0x58] sm:$0xff] }
   0x7   :  { %v24_v12 = vld [vmem:[%s231_s0 + $0x60] sm:$0xff]  ;;  %v25_v13 = vld [vmem:[%s231_s0 + $0x68] sm:$0xff]  ;;  %v26_v14 = vld [vmem:[%s231_s0 + $0x70] sm:$0xff]  ;;  %v88_v25 = vadd.s32 8, %v87_v22 }
   0x8   :  { %v27_v15 = vld [vmem:[%s231_s0 + $0x78] sm:$0xff]  ;;  %v124_v26 = vld [vmem:[%s232_s1] ss:$0 sm:$0xff]  ;;  %s158_s0 = smov [#allocation2]  }
   0x9   :  { %vm91_vm1 = vcmp.eq.s32.totalorder %v88_v25, %v124_v26  ;;  %vm90_vm2 = vcmp.eq.s32.totalorder %v87_v22, %v124_v26  ;;  %s111_s1 = sshll.u32 %s158_s0, 4  ;;  %s112_s1 = int_to_ptr.vmem [resolvable:$true] %s111_s1 }
   0xa   :  { %29 = vxpose.xlu0.b32.cont [2/16] (narrow) %v13_v1, 16  ;;  %v93_v33 = vsel %vm91_vm1, 0.91, %v157_v32  ;;  %v92_v36 = vsel %vm90_vm2, 0.91, %v157_v32 }
  0x12   :  { %30 = vxpose.xlu0.b32.cont [3/16] (narrow) %v14_v2, 16 }
  0x1a   :  { %31 = vxpose.xlu0.b32.cont [4/16] (narrow) %v15_v3, 16 }
  0x22   :  { %32 = vxpose.xlu0.b32.cont [5/16] (narrow) %v16_v4, 16 }
  0x2a   :  { %33 = vxpose.xlu0.b32.cont [6/16] (narrow) %v17_v5, 16 }
  0x32   :  { %34 = vxpose.xlu0.b32.cont [7/16] (narrow) %v18_v6, 16 }
  0x3a   :  { %35 = vxpose.xlu0.b32.cont [8/16] (narrow) %v19_v7, 16 }
  0x42   :  { %36 = vxpose.xlu0.b32.cont [9/16] (narrow) %v20_v8, 16 }
  0x4a   :  { %37 = vxpose.xlu0.b32.cont [10/16] (narrow) %v21_v9, 16 }
  0x52   :  { %38 = vxpose.xlu0.b32.cont [11/16] (narrow) %v22_v10, 16 }
  0x5a   :  { %39 = vxpose.xlu0.b32.cont [12/16] (narrow) %v23_v11, 16 }
  0x62   :  { %40 = vxpose.xlu0.b32.cont [13/16] (narrow) %v24_v12, 16 }
  0x6a   :  { %41 = vxpose.xlu0.b32.cont [14/16] (narrow) %v25_v13, 16 }
  0x72   :  { %42 = vxpose.xlu0.b32.cont [15/16] (narrow) %v26_v14, 16 }
  0x7a   :  { %43 = vxpose.xlu0.b32.end [16/16] (narrow) %v27_v15, 16 }
  0xa6   :  { %v44_v16 = vpop.trf.xlu0 }
  0xae   :  { %v45_v17 = vpop.trf.xlu0 }
  0xaf   :  { %v61_v18 = vsel %vm60_vm0, %v45_v17, -inf }
  0xb0   :  { %v62_v20 = vmax.f32 %v44_v16, %v61_v18 }
  0xb2   :  { %v63_v21 = vrot.slane %v62_v20, 4 }
  0xb4   :  { %v64_v23 = vmax.f32 %v62_v20, %v63_v21 }
  0xb6   :  { %v65_v24 = vrot.slane %v64_v23, 2 }
  0xb8   :  { %v66_v27 = vmax.f32 %v64_v23, %v65_v24 }
  0xba   :  { %v67_v28 = vrot.slane %v66_v27, 1 }
  0xbc   :  { %v68_v29 = vmax.f32 %v66_v27, %v67_v28 }
  0xbe   :  { %v69_v30 = vsub.f32 %v44_v16, %v68_v29  ;;  %v70_v31 = vsub.f32 %v45_v17, %v68_v29 }
  0xc0   :  { %v71_v34 = vmul.f32 1.442695, %v69_v30  ;;  %v73_v35 = vmul.f32 1.442695, %v70_v31  ;;  %v95_v37 = vmul.f32 %v93_v33, %v70_v31  ;;  %v94_v38 = vmul.f32 %v92_v36, %v69_v30 }
  0xc2   :  { %125 = vpow2.f32 %v71_v34  ;;  %v96_v39 = vsel %vm60_vm0, %v95_v37, 0.0 }
  0xc3   :  { %127 = vpow2.f32 %v73_v35  ;;  %v97_v41 = vadd.f32 %v96_v39, %v94_v38 }
  0xc5   :  { %v98_v45 = vrot.slane %v97_v41, 4 }
  0xc7   :  { %v99_v48 = vadd.f32 %v98_v45, %v97_v41 }
  0xc8   :  { %v126_v40 = vpop.eup %125 }
  0xc9   :  { %v128_v42 = vpop.eup %127  ;;  %v100_v51 = vrot.slane %v99_v48, 2 }
  0xca   :  { %v75_v43 = vsel %vm60_vm0, %v128_v42, 0.0 }
  0xcb   :  { %v76_v44 = vadd.f32 %v126_v40, %v75_v43  ;;  %v101_v54 = vadd.f32 %v100_v51, %v99_v48 }
  0xcd   :  { %v77_v46 = vrot.slane %v76_v44, 4  ;;  %v102_v55 = vrot.slane %v101_v54, 1 }
  0xcf   :  { %v78_v47 = vadd.f32 %v77_v46, %v76_v44  ;;  %v103_v58 = vadd.f32 %v102_v55, %v101_v54 }
  0xd1   :  { %v79_v49 = vrot.slane %v78_v47, 2 }
  0xd3   :  { %v80_v50 = vadd.f32 %v79_v49, %v78_v47 }
  0xd5   :  { %v81_v52 = vrot.slane %v80_v50, 1 }
  0xd7   :  { %v82_v53 = vadd.f32 %v81_v52, %v80_v50 }
  0xd9   :  { %129 = vlog2.f32 %v82_v53 }
  0xdf   :  { %v130_v56 = vpop.eup %129 }
  0xe0   :  { %v84_v57 = vmul.f32 0.6931472, %v130_v56 }
  0xe2   :  { %v104_v59 = vsub.f32 %v84_v57, %v103_v58 }
  0xe4   :  { %105 = vst [vmem:[#allocation2] sm:$0x1] %v104_v59 }
  0xe5   :  { %116 = dma.vmem_to_hbm [thread:$0]  %s112_s1, 16, %s114_s17, [#allocation3]  }
  0xe6   :  { %155 = dma.done.wait [#allocation3], 16  }
  0xe7   :  { %156 = vsyncadd [#allocation3], 4294967280 }
  0xe8   :  { %121 = vsyncpa [#allocation3], 1 }

</bundles_post_ra>
